<compile_context>
chip_gen: v7x
topology: tpu7x:2x2x1
jax: 0.10.0
libtpu: 0.0.40
codegen_flags: <defaults>
</compile_context>

<pallas_src>
import functools

import jax
import jax.numpy as jnp
from jax.experimental import pallas as pl
from jax.experimental.pallas import tpu as pltpu

_LANE = 128                            # vreg lane width (lane-dense last dim)
_TARGET_BLOCK_BYTES = 2 * 1024 * 1024  # ~2 MiB per block (4 buffers -> ~8 MiB VMEM)
_VMEM_LIMIT_BYTES = 32 * 1024 * 1024   # explicit scoped-VMEM limit; safe on v5e/v6e/v7x
_LOG2_E = 1.4426950408889634


def _sublane_multiple(dtype):
    """Second-minor tiling granule per dtype: f32->8, bf16->16, int8/fp8->32."""
    return max(8, 32 // jnp.dtype(dtype).itemsize)


def _gaussian_kernel(x_ref, o_ref, *, scale2, norm_factor, c):
    """out = norm_factor * exp2(scale2 * x^2) + c, scale2 = -0.5*log2(e)/w^2."""
    x = x_ref[...].astype(jnp.float32)       # cast in-register (I/O stays in orig dtype)
    y = jnp.exp2(x * x * scale2)             # VPU muls + EUP exp2 (no extra log2(e) mul)
    if norm_factor != 1.0:                   # trace-time constant folding
        y = y * norm_factor
    if c != 0.0:
        y = y + c
    o_ref[...] = y.astype(o_ref.dtype)


def gaussian_kernel_forward(x, w=1.0, c=0.0, normalize=False):
    """Pallas equivalent of GaussianKernel(w, c, normalize).forward(x)."""
    w = float(w)
    c = float(c)
    scale2 = -0.5 * _LOG2_E / (w * w)
    norm_factor = (1.0 / (2.0 * w)) if normalize else 1.0

    orig_shape = x.shape
    if not jnp.issubdtype(x.dtype, jnp.floating):
        x = x.astype(jnp.float32)            # torch.exp on ints returns float too
    io_dtype = x.dtype
    itemsize = jnp.dtype(io_dtype).itemsize
    sub = _sublane_multiple(io_dtype)

    n = x.size
    if n == 0:
        return jnp.zeros(orig_shape, io_dtype)

    rows = -(-n // _LANE)                                      # ceil div
    cap_rows = max(sub, (_TARGET_BLOCK_BYTES // (_LANE * itemsize)) // sub * sub)

    # >= 2 grid steps when there is enough data so v7x's second TC gets work.
    min_tiles = 2 if rows >= 2 * sub else 1
    num_tiles = max(min_tiles, -(-rows // cap_rows))
    tile_rows = -(-rows // num_tiles)
    tile_rows = -(-tile_rows // sub) * sub                     # sublane multiple
    num_tiles = -(-rows // tile_rows)
    padded_rows = num_tiles * tile_rows

    xf = x.reshape(-1)
    pad = padded_rows * _LANE - n
    if pad:
        # Zero padding is safe: padded lanes give finite values and are sliced off.
        xf = jnp.pad(xf, (0, pad))
    x2 = xf.reshape(padded_rows, _LANE)                        # lane-dense slab

    kernel = functools.partial(
        _gaussian_kernel, scale2=scale2, norm_factor=norm_factor, c=c
    )

    out2 = pl.pallas_call(
        kernel,
        out_shape=jax.ShapeDtypeStruct((padded_rows, _LANE), io_dtype),
        grid=(num_tiles,),
        in_specs=[pl.BlockSpec((tile_rows, _LANE), lambda i: (i, 0))],
        out_specs=pl.BlockSpec((tile_rows, _LANE), lambda i: (i, 0)),
        compiler_params=pltpu.CompilerParams(
            dimension_semantics=("parallel",),
            vmem_limit_bytes=_VMEM_LIMIT_BYTES,
        ),
    )(x2)

    if pad:
        out = out2.reshape(-1)[:n].reshape(orig_shape)
    else:
        out = out2.reshape(orig_shape)                         # free, no copy path
    return out


if __name__ == "__main__":
    key = jax.random.PRNGKey(0)
    B, C, H, W = 2, 4, 16, 16
    x_f32 = jax.random.normal(key, (B, C, H, W), jnp.float32) * 3.0
    x_bf16 = x_f32.astype(jnp.bfloat16)                        # exercises in-kernel cast
    x_ragged = jax.random.normal(key, (3, 5, 7), jnp.float32)  # exercises pad/slice path

    # Pure-JAX reference mirroring the PyTorch forward exactly (f32 math).
    def ref(x, w=1.0, c=0.0, normalize=False):
        xf = x.astype(jnp.float32)
        norm = (1.0 / (2.0 * w)) if normalize else 1.0
        return norm * jnp.exp(-0.5 * (xf / w) ** 2) + c

    cases = [
        (x_f32, dict(w=1.0, c=0.0, normalize=False), 1e-5),   # module defaults
        (x_f32, dict(w=2.0, c=0.5, normalize=True), 1e-5),    # non-trivial scalars
        (x_f32, dict(w=0.7, c=-1.25, normalize=False), 1e-5),
        (x_bf16, dict(w=1.5, c=0.25, normalize=True), 2e-2),  # bf16 I/O
        (x_ragged, dict(w=1.0, c=0.0, normalize=False), 1e-5),
    ]

    ok = True
    results = []
    for xin, cfg, tol in cases:
        got = gaussian_kernel_forward(xin, **cfg)
        want = ref(xin, **cfg)
        results.append(got)
        ok &= bool(
            jnp.allclose(got.astype(jnp.float32), want, atol=tol, rtol=tol)
        )

    jax.block_until_ready(results)

    if ok:
        print("KERNEL_OK")
    else:
        raise SystemExit("mismatch vs reference")
</pallas_src>

<mosaic_0001>
module attributes {stable_mosaic.version = 11 : i64} {
  func.func @_gaussian_kernel(%arg0: i32, %arg1: memref<8x128xf32, #tpu.memory_space<vmem>>, %arg2: memref<8x128xf32, #tpu.memory_space<vmem>>) attributes {dimension_semantics = [#tpu.dimension_semantics<parallel>], iteration_bounds = array<i64: 2>, scalar_prefetch = 0 : i64, scratch_operands = 0 : i64, tpu.core_type = #tpu.core_type<tc>, window_params = [{transform_indices = @transform_0, window_bounds = array<i64: 8, 128>}, {transform_indices = @transform_1, window_bounds = array<i64: 8, 128>}]} {
    %c0 = arith.constant 0 : index
    %c0_0 = arith.constant 0 : index
    %0 = vector.load %arg1[%c0, %c0_0] : memref<8x128xf32, #tpu.memory_space<vmem>>, vector<8x128xf32>
    %1 = arith.mulf %0, %0 : vector<8x128xf32>
    %cst = arith.constant -0.72134751 : f32
    %2 = vector.broadcast %cst : f32 to vector<8x128xf32>
    %3 = arith.mulf %1, %2 : vector<8x128xf32>
    %4 = math.exp2 %3 : vector<8x128xf32>
    %c0_1 = arith.constant 0 : index
    %c0_2 = arith.constant 0 : index
    %5 = vector.load %arg2[%c0_1, %c0_2] : memref<8x128xf32, #tpu.memory_space<vmem>>, vector<8x128xf32>
    tpu.vector_store %arg2[%c0_1, %c0_2], %4 {strides = array<i32>} : memref<8x128xf32, #tpu.memory_space<vmem>>, vector<8x128xf32>,
    return
  }
  func.func @transform_0(%arg0: i32) -> (i32, i32) {
    %c0_i32 = arith.constant 0 : i32
    %c0_i32_0 = arith.constant 0 : i32
    return %arg0, %c0_i32 : i32, i32
  }
  func.func @transform_1(%arg0: i32) -> (i32, i32) {
    %c0_i32 = arith.constant 0 : i32
    %c0_i32_0 = arith.constant 0 : i32
    return %arg0, %c0_i32 : i32, i32
  }
}

</mosaic_0001>

<bundles_post_ra>
// kernel: tpu_custom_call.1
= control target key start
LH: loop header
LB: loop body
LE: loop exit
PB: predicated region body
PF: predicated region fallthrough
CT: control target
= control target key end

     0   :  { %6 = vsyncpa [#allocation3], 0  ;;  %s552_s0 = inlined_call_operand.hbm [shape: f32[16,128], index: 0, kind: input, shape index: {}]   ;;  %s553_s1 = inlined_call_operand.hbm [shape: f32[16,128], index: 1, kind: output, shape index: {}]  }
   0x1   :  { %8 = vsyncpa [#allocation3 + $0x1], 0 }
   0x2   :  { %9 = vsyncpa [#allocation4], 0 }
   0x3   :  { %11 = vsyncpa [#allocation4 + $0x1], 0  ;;  %s391_s6 = smov 0   ;;  %s393_s7 = smov 0  }
   0x4   :  { %s395_s8 = smov 0   ;;  %s397_s9 = smov 0  }
   0x5 LB: > { %s412_s10 = sadd.s32 4294967295, %s377_s9   ;;  %s221_s11 = sadd.s32 4294967294, %s377_s9   ;;  %s377_s9 = sphi %s397_s9, %s568_s9   ;;  %s373_s8 = sphi %s395_s8, %s567_s8   ;;  %s369_s7 = sphi %s393_s7, %s566_s7   ;;  %s365_s6 = sphi %s391_s6, %s565_s6  }
   0x6   : > { %s416_s12 = sadd.s32 1, %s377_s9   ;;  %s24_s13 = sadd.s32 1, %s373_s8 }
   0x7   : > { %s21_s14 = ssub.s32 %s377_s9, %s416_s12  ;;  %p31_p0 = scmp.ne.s32.totalorder %s373_s8, %s369_s7 }
   0x8   : > { %p22_p1 = scmp.eq.s32.totalorder %s21_s14, 0  ;;  %p32_p2 = scmp.eq.s32.totalorder %s377_s9, 0 }
   0x9   : > { %p37_p3 = scmp.ne.s32.totalorder %s369_s7, %s365_s6  ;;  %p38_p4 = scmp.eq.s32.totalorder %s412_s10, 0 }
   0xa   : > { %s428_s15 = scalar_select %p22_p1, %s373_s8, %s24_s13  }
   0xb   : > { %p430_p5 = por %p32_p2, %p31_p0  ;;  %p434_p6 = por %p38_p4, %p37_p3 }
   0xc   : > { %p61_p7 = scmp.eq.s32.totalorder %s412_s10, 1  ;;  %p67_p8 = scmp.eq.s32.totalorder %s221_s11, 1 }
   0xd   : > { %p245_p10 = scmp.lt.s32.totalorder %s377_s9, 2  ;;  %s87_s20 = sand.u32 1, %s373_s8  }
   0xe   : > { %p441_p11 = por %p61_p7, %p31_p0  ;;  %p445_p12 = por %p67_p8, %p37_p3 }
   0xf   : > { %s225_s21 = sshll.u32 %s377_s9, 7  ;;  %s224_s22 = sshll.u32 %s87_s20, 3 }
  0x10   : > { %s557_s18 = scalar_select %p441_p11, 1, 0 }
  0x11   : > { %s558_s19 = scalar_select %p445_p12, 1, 0 }
  0x12   : > { %s454_s25 = scalar_lea.hbm %s552_s0, %s225_s21  ;;  %s91_s26 = scalar_lea.vmem [#allocation2], %s224_s22 }
  0x13   : > { %s98_s27 = sshll.u32 %s91_s26, 4  ;;  %p458_p13 = pnand %p245_p10, %p430_p5  ;;  %s462_s27 = int_to_ptr.vmem [resolvable:$true] %s98_s27 }
  0x14   : > { %s88_s29 = scalar_lea.sflag [#allocation3], %s87_s20  ;;  %s281_s30 = scalar_lea.hbm %s454_s25, 128 }
  0x15   : > { %p282_p2 = scmp.ne.s32.totalorder %s454_s25, %s281_s30  ;;  %p283_p3 = pneg %p458_p13 }
  0x16   : > { %s286_s4 = scalar_lea.hbm %s552_s0, 256  ;;  %p287_p5 = scmp.lt.u32.totalorder %s454_s25, %s552_s0 }
  0x17   : > { %p284_p4 = pnand %p283_p3, %p282_p2  ;;  %p288_p8 = scmp.lt.u32.totalorder %s286_s4, %s281_s30 }
  0x18   : > { %p290_p9 = scmp.lt.u32.totalorder %s281_s30, %s454_s25 }
  0x19   : > { %p285_p7 = pneg %p284_p4  ;;  %p289_p10 = por %p288_p8, %p287_p5 }
  0x1b   : > { %p291_p0 = por %p290_p9, %p289_p10 }
  0x1d   : > { %p292_p1 = pnand %p291_p0, %p285_p7 }
  0x1f   : > { %295 = shalt.err (!%p292_p1)
}
  0x20   : > { %s296_s13 = scalar_lea.vmem %s462_s27, 128  ;;  %s379_s14 = smov [#allocation2]  }
  0x21   : > { %p297_p2 = scmp.ne.s32.totalorder %s462_s27, %s296_s13  ;;  %s301_s16 = sshll.u32 %s379_s14, 4  ;;  %s302_s16 = int_to_ptr.vmem [resolvable:$false] %s301_s16 }
  0x22   : > { %s303_s20 = scalar_lea.vmem %s302_s16, 256  ;;  %p304_p11 = scmp.lt.s32.totalorder %s462_s27, %s302_s16 }
  0x23   : > { %p299_p4 = pnand %p297_p2, %p283_p3  ;;  %p305_p5 = scmp.lt.s32.totalorder %s303_s20, %s296_s13 }
  0x25   : > { %p300_p12 = pneg %p299_p4  ;;  %p306_p8 = por %p305_p5, %p304_p11 }
  0x27   : > { %p307_p9 = pnand %p306_p8, %p300_p12 }
  0x29   : > { %310 = shalt.err (!%p307_p9)
}
  0x2a   : > { %240 = dma.hbm_to_vmem [thread:$0]  (!%p458_p13), %s454_s25, 128, %s462_s27, %s88_s29  }
  0x2b   : > { %p560_p0 = scmp.lt.s32.totalorder %s377_s9, 3  ;;  %p561_p1 = scmp.ge.s32.totalorder %s377_s9, 1 }
  0x2d   : > { %p104_p3 = pnand %p561_p1, %p560_p0 }
  0x2e   : > { %s496_s21 = sand.u32 (!%p104_p3), 1, %s369_s7  }
  0x2f   : > { %107 = sbr.rel (%p104_p3) target bundleno = 85 (0x55), region = 24  ;;  %s227_s22 = sshll.u32 (!%p104_p3), %s496_s21, 3 }
  0x30   : > { %s110_s23 = scalar_lea.sflag (!%p104_p3), [#allocation3], %s496_s21  ;;  %s113_s24 = scalar_lea.vmem (!%p104_p3), [#allocation2], %s227_s22 }
  0x36   : > { %356 = dma.done.wait (%p434_p6), %s110_s23, 128  }
  0x37   : > { %358 = vsyncadd (%p434_p6), %s110_s23, 4294967168  ;;  %v132_v0 = vld [vmem:[%s113_s24] sm:$0xff]  ;;  %s131_s25 = scalar_lea.vmem [#allocation5], %s227_s22  ;;  %s230_s27 = sshll.u32 %s412_s10, 7 }
  0x38   : > { %v133_v1 = vmul.f32 %v132_v0, %v132_v0  ;;  %s151_s26 = sshll.u32 %s131_s25, 4  ;;  %s510_s17 = scalar_lea.hbm %s553_s1, %s230_s27  ;;  %s505_s26 = int_to_ptr.vmem [resolvable:$true] %s151_s26 }
  0x39   : > { %s138_s30 = scalar_lea.sflag [#allocation4], %s496_s21  ;;  %s311_s2 = scalar_lea.vmem %s505_s26, 128 }
  0x3a   : > { %v134_v2 = vmul.f32 -0.7213475, %v133_v1  ;;  %p312_p6 = scmp.ne.s32.totalorder %s505_s26, %s311_s2  ;;  %p562_p11 = scmp.ne.s32.totalorder %s557_s18, 0 }
  0x3b   : > { %s380_s3 = smov [#allocation5]  }
  0x3c   : > { %279 = vpow2.f32 %v134_v2  ;;  %p313_p12 = pnand %p312_p6, %p562_p11  ;;  %s315_s10 = sshll.u32 %s380_s3, 4  ;;  %s316_s10 = int_to_ptr.vmem [resolvable:$false] %s315_s10 }
  0x3d   : > { %s317_s4 = scalar_lea.vmem %s316_s10, 256  ;;  %p318_p7 = scmp.lt.s32.totalorder %s505_s26, %s316_s10 }
  0x3e   : > { %p314_p13 = pneg %p313_p12  ;;  %p319_p10 = scmp.lt.s32.totalorder %s317_s4, %s311_s2 }
  0x40   : > { %p320_p2 = por %p319_p10, %p318_p7 }
  0x42   : > { %p321_p4 = pnand %p320_p2, %p314_p13 }
  0x46   : > { %v280_v3 = vpop.eup %279 }
  0x47   : > { %136 = vst [vmem:[%s131_s25] sm:$0xff] %v280_v3 }
  0x48   : > { %324 = shalt.err (!%p321_p4)
}
  0x49   : > { %s325_s5 = scalar_lea.hbm %s510_s17, 128  ;;  %s329_s14 = scalar_lea.hbm %s553_s1, 256 }
  0x4a   : > { %p326_p5 = scmp.ne.s32.totalorder %s510_s17, %s325_s5  ;;  %p330_p0 = scmp.lt.u32.totalorder %s510_s17, %s553_s1 }
  0x4b   : > { %p331_p1 = scmp.lt.u32.totalorder %s329_s14, %s325_s5  ;;  %p333_p6 = scmp.lt.u32.totalorder %s325_s5, %s510_s17 }
  0x4c   : > { %p327_p8 = pnand %p326_p5, %p562_p11 }
  0x4d   : > { %p332_p3 = por %p331_p1, %p330_p0 }
  0x4e   : > { %p328_p9 = pneg %p327_p8 }
  0x4f   : > { %p334_p12 = por %p333_p6, %p332_p3 }
  0x51   : > { %p335_p13 = pnand %p334_p12, %p328_p9 }
  0x53   : > { %338 = shalt.err (!%p335_p13)
}
  0x54   : > { %235 = dma.vmem_to_hbm [thread:$0]  (%p562_p11), %s505_s26, 128, %s510_s17, %s138_s30  }
  0x55 PF: > { %s163_s21 = sand.u32 1, %s365_s6   ;;  %p563_p7 = scmp.ne.s32.totalorder %s558_s19, 0 }
  0x56   : > { %p564_p10 = scmp.ge.s32.totalorder %s377_s9, 2  ;;  %s164_s22 = scalar_lea.sflag [#allocation4], %s163_s21 }
  0x58   : > { %p242_p2 = pnand %p564_p10, %p563_p7 }
  0x5a   : > { %360 = dma.done.wait (!%p242_p2), %s164_s22, 128  }
  0x5b   : > { %362 = vsyncadd (!%p242_p2), %s164_s22, 4294967168  ;;  %p14_p4 = scmp.ge.s32.totalorder %s416_s12, 4   ;;  %s565_s6 = smov %s369_s7 }
  0x5c   : > { %s566_s7 = smov %s373_s8  ;;  %s567_s8 = smov %s428_s15 }
  0x5d   : > { %s568_s9 = smov %s416_s12  ;;  %16 = sbr.rel (!%p14_p4) target bundleno = 5 (0x5), region = 69 }
  0x64   :  { %169 = vsyncpa [#allocation3], 1 }
  0x65   :  { %171 = vsyncpa [#allocation3 + $0x1], 1 }
  0x66   :  { %172 = vsyncpa [#allocation4], 1 }
  0x67   :  { %174 = vsyncpa [#allocation4 + $0x1], 1 }

</bundles_post_ra>
